<compile_context>
chip_gen: v6e
topology: v6e:2x2x1
jax: 0.10.0
libtpu: 0.0.40
codegen_flags: <defaults>
</compile_context>

<pallas_src>
import math

import jax
import jax.numpy as jnp
from jax.experimental import pallas as pl
from jax.experimental.pallas import tpu as pltpu

_LANE = 128


def _drop_path_kernel(x_ref, s_ref, o_ref):
    # Pure HBM-streaming body: one broadcasted VPU multiply per tile.
    # (Review: no VLIW slot saturates here; all tuning lives in the wrapper.)
    o_ref[...] = (x_ref[...].astype(jnp.float32) * s_ref[...]).astype(o_ref.dtype)


def _sublane_pack(itemsize: int) -> int:
    # vreg sublane packing: 8 rows for 32-bit, 16 for 16-bit, 32 for 8-bit.
    return {4: 8, 2: 16, 1: 32}.get(itemsize, 8)


def _round_down(v: int, m: int) -> int:
    return (v // m) * m


def _pick_lane_width(feat_padded: int, batch: int, sublane: int) -> int:
    """Largest lane width (multiple of 128) dividing feat_padded, preferring one
    that still yields >= sublane total rows so vregs stay fully packed."""
    candidates = [l for l in (1024, 512, 256, _LANE) if feat_padded % l == 0]
    for l in candidates:
        if batch * (feat_padded // l) >= sublane:
            return l
    return candidates[-1]


def _pick_row_tile(rows, cols, itemsize, sublane, target_bytes=4 << 20, min_grid=4):
    """Row tile of ~target_bytes per buffer, rounded to the dtype's sublane
    packing, capped so the grid keeps >= min_grid steps (v7x dual-TC) when
    `rows` allows it."""
    bytes_per_row = max(1, cols * itemsize)
    tile = max(sublane, _round_down(target_bytes // bytes_per_row, sublane))
    cap = max(sublane, _round_down(pl.cdiv(rows, min_grid), sublane))
    tile = min(tile, cap)
    if tile >= rows:
        return rows
    return tile


def drop_path_pallas(x, drop_prob: float, training: bool, key, donate: bool = False):
    """Same semantics as the PyTorch drop_path:
       - identity if drop_prob == 0.0 or not training
       - otherwise per-sample Bernoulli(keep_prob) mask, x / keep_prob * mask.
    """
    if drop_prob == 0.0 or not training:
        return x

    keep_prob = 1.0 - drop_prob
    B = x.shape[0]
    feat = int(math.prod(x.shape[1:]))

    # Per-sample mask/scale in float32 (torch recipe: floor(keep_prob + U[0,1))).
    rand = jax.random.uniform(key, (B,), dtype=jnp.float32)
    mask = jnp.floor(keep_prob + rand)
    scale = mask / keep_prob                      # (B,) f32, values in {0, 1/keep_prob}

    itemsize = jnp.dtype(x.dtype).itemsize
    sublane = _sublane_pack(itemsize)

    # --- Lane-dense slab: pad feature dim up to a multiple of 128 if needed. ---
    pad_cols = (-feat) % _LANE
    feat_p = feat + pad_cols
    xf = x.reshape(B, feat)
    if pad_cols:
        xf = jnp.pad(xf, ((0, 0), (0, pad_cols)))

    lane = _pick_lane_width(feat_p, B, sublane)
    rows_per_sample, cols = feat_p // lane, lane
    rows = B * rows_per_sample

    xr = xf.reshape(rows, cols)
    row_scale = jnp.repeat(scale, rows_per_sample).reshape(rows, 1)  # f32

    tile_r = _pick_row_tile(rows, cols, itemsize, sublane)
    grid = (pl.cdiv(rows, tile_r),)

    # VMEM budget: x + out, each double-buffered (4x tile) + tiny scale bufs.
    tile_bytes = tile_r * cols * itemsize
    vmem_limit = int(min(max(4 * tile_bytes + (2 << 20), 32 << 20), 48 << 20))

    # Only alias when the caller donates x (otherwise XLA inserts a defensive
    # full copy, doubling HBM traffic for this mem-bound op) and no padding.
    io_aliases = {0: 0} if (donate and pad_cols == 0) else {}

    out = pl.pallas_call(
        _drop_path_kernel,
        out_shape=jax.ShapeDtypeStruct((rows, cols), x.dtype),
        grid=grid,
        in_specs=[
            pl.BlockSpec((tile_r, cols), lambda i: (i, 0)),
            pl.BlockSpec((tile_r, 1), lambda i: (i, 0)),
        ],
        out_specs=pl.BlockSpec((tile_r, cols), lambda i: (i, 0)),
        input_output_aliases=io_aliases,
        compiler_params=pltpu.CompilerParams(
            dimension_semantics=("parallel",),
            vmem_limit_bytes=vmem_limit),
    )(xr, row_scale)

    if pad_cols:
        return out.reshape(B, feat_p)[:, :feat].reshape(x.shape)
    return out.reshape(x.shape)


class DropPath:
    """JAX/Pallas equivalent of the PyTorch DropPath module."""

    def __init__(self, drop_prob=None):
        self.drop_prob = drop_prob if drop_prob is not None else 0.0
        self.training = True

    def __call__(self, x, key, donate: bool = False):
        return drop_path_pallas(x, float(self.drop_prob), self.training, key,
                                donate=donate)


if __name__ == "__main__":
    key = jax.random.PRNGKey(0)
    k_x, k_mask, k_x2, k_x3 = jax.random.split(key, 4)

    drop_prob = 0.5
    keep_prob = 1.0 - drop_prob

    module = DropPath(drop_prob=drop_prob)
    module.training = True

    # ---- f32, lane-dense path ------------------------------------------------
    B, C, H, W = 2, 4, 16, 16
    x = jax.random.normal(k_x, (B, C, H, W), dtype=jnp.float32)
    y = jax.block_until_ready(module(x, k_mask))

    rand = jax.random.uniform(k_mask, (B,), dtype=jnp.float32)
    mask = jnp.floor(keep_prob + rand).reshape(B, 1, 1, 1)
    ref = x / keep_prob * mask
    assert jnp.allclose(y, ref, atol=1e-6), "f32 mismatch vs reference"

    # ---- bf16 (f32-scale numerics, looser tolerance) ---------------------------
    xb = jax.random.normal(k_x2, (B, C, H, W), dtype=jnp.float32).astype(jnp.bfloat16)
    yb = jax.block_until_ready(module(xb, k_mask))
    refb = (xb.astype(jnp.float32) / keep_prob * mask).astype(jnp.bfloat16)
    assert jnp.allclose(yb.astype(jnp.float32), refb.astype(jnp.float32),
                        rtol=1e-2, atol=1e-2), "bf16 mismatch vs reference"

    # ---- non-multiple-of-128 feature size (padded lane-dense path) ------------
    x3 = jax.random.normal(k_x3, (B, 3, 5, 7), dtype=jnp.float32)
    y3 = jax.block_until_ready(module(x3, k_mask))
    ref3 = x3 / keep_prob * mask.reshape(B, 1, 1, 1)
    assert jnp.allclose(y3, ref3, atol=1e-6), "padded-path mismatch vs reference"

    # ---- eval mode: identity ----------------------------------------------------
    module.training = False
    y_eval = jax.block_until_ready(module(x, k_mask))
    assert jnp.array_equal(y_eval, x), "eval mode must be identity"

    print("KERNEL_OK")
</pallas_src>

<mosaic_0001>
module attributes {stable_mosaic.version = 11 : i64} {
  func.func @_drop_path_kernel(%arg0: i32, %arg1: memref<8x256xf32, #tpu.memory_space<vmem>>, %arg2: memref<8x1xf32, #tpu.memory_space<vmem>>, %arg3: memref<8x256xf32, #tpu.memory_space<vmem>>) attributes {dimension_semantics = [#tpu.dimension_semantics<parallel>], iteration_bounds = array<i64: 1>, scalar_prefetch = 0 : i64, scratch_operands = 0 : i64, tpu.core_type = #tpu.core_type<tc>, window_params = [{transform_indices = @transform_0, window_bounds = array<i64: 8, 256>}, {transform_indices = @transform_1, window_bounds = array<i64: 8, 1>}, {transform_indices = @transform_2, window_bounds = array<i64: 8, 256>}]} {
    %c0 = arith.constant 0 : index
    %c0_0 = arith.constant 0 : index
    %0 = vector.load %arg1[%c0, %c0_0] : memref<8x256xf32, #tpu.memory_space<vmem>>, vector<8x256xf32>
    %c0_1 = arith.constant 0 : index
    %c0_2 = arith.constant 0 : index
    %1 = vector.load %arg2[%c0_1, %c0_2] : memref<8x1xf32, #tpu.memory_space<vmem>>, vector<8x1xf32>
    %2 = vector.broadcast %1 : vector<8x1xf32> to vector<8x256xf32>
    %3 = arith.mulf %0, %2 : vector<8x256xf32>
    %c0_3 = arith.constant 0 : index
    %c0_4 = arith.constant 0 : index
    %4 = vector.load %arg3[%c0_3, %c0_4] : memref<8x256xf32, #tpu.memory_space<vmem>>, vector<8x256xf32>
    tpu.vector_store %arg3[%c0_3, %c0_4], %3 {strides = array<i32>} : memref<8x256xf32, #tpu.memory_space<vmem>>, vector<8x256xf32>,
    return
  }
  func.func @transform_0(%arg0: i32) -> (i32, i32) {
    %c0_i32 = arith.constant 0 : i32
    %c0_i32_0 = arith.constant 0 : i32
    return %arg0, %c0_i32 : i32, i32
  }
  func.func @transform_1(%arg0: i32) -> (i32, i32) {
    %c0_i32 = arith.constant 0 : i32
    %c0_i32_0 = arith.constant 0 : i32
    return %arg0, %c0_i32 : i32, i32
  }
  func.func @transform_2(%arg0: i32) -> (i32, i32) {
    %c0_i32 = arith.constant 0 : i32
    %c0_i32_0 = arith.constant 0 : i32
    return %arg0, %c0_i32 : i32, i32
  }
}

</mosaic_0001>

<bundles_post_ra>
// kernel: tpu_custom_call.1
= control target key start
LH: loop header
LB: loop body
LE: loop exit
PB: predicated region body
PF: predicated region fallthrough
CT: control target
= control target key end

     0   :  { %7 = vsyncpa [#allocation3], 0  ;;  %s126_s0 = inlined_call_operand.hbm [shape: f32[8,256], index: 0, kind: input, shape index: {}]   ;;  %s127_s1 = inlined_call_operand.vmem [shape: f32[8,1], index: 1, kind: input, shape index: {}]   ;;  %s128_s2 = inlined_call_operand.hbm [shape: f32[8,256], index: 2, kind: output, shape index: {}]  }
   0x1   :  { %8 = vsyncpa [#allocation4], 0  ;;  %s99_s9 = smov [#allocation2]  }
   0x2   :  { %s15_s10 = sshll.u32 %s99_s9, 4  ;;  %s16_s10 = int_to_ptr.vmem [resolvable:$true] %s15_s10 }
   0x3   :  { %s63_s11 = scalar_lea.vmem %s16_s10, 256  ;;  %p68_p1 = scmp.lt.s32.totalorder %s16_s10, %s16_s10 }
   0x4   :  { %p64_p0 = scmp.ne.s32.totalorder %s16_s10, %s63_s11  ;;  %p69_p2 = scmp.lt.s32.totalorder %s63_s11, %s63_s11 }
   0x6   :  { %p70_p3 = por %p69_p2, %p68_p1 }
   0x8   :  { %p71_p4 = pnand %p70_p3, %p64_p0 }
   0xa   :  { %74 = shalt.err (!%p71_p4)
}
   0xb   :  { %18 = dma.hbm_to_vmem [thread:$0]  %s126_s0, 256, %s16_s10, [#allocation3]  }
   0xc   :  { %95 = dma.done.wait [#allocation3], 256  }
   0xd   :  { %96 = vsyncadd [#allocation3], 4294967040  ;;  %v100_v0 = vmov 0   ;;  %v26_v1 = vld [vmem:[%s127_s1] sm:$0xff]  ;;  %v25_v3 = vld [vmem:[#allocation2 + $0x8] sm:$0xff]  ;;  %s101_s16 = smov [#allocation5]  }
   0xe   :  { %54 = vset.pattern.permute.xlu0 %v100_v0  ;;  %v24_v2 = vld [vmem:[#allocation2] sm:$0xff]  ;;  %s42_s17 = sshll.u32 %s101_s16, 4  ;;  %s43_s17 = int_to_ptr.vmem [resolvable:$true] %s42_s17 }
   0xf   :  { %29 = vperm.xlu0 %54, %v26_v1   ;;  %s75_s0 = scalar_lea.vmem %s43_s17, 256  ;;  %p80_p6 = scmp.lt.s32.totalorder %s43_s17, %s43_s17 }
  0x10   :  { %p76_p5 = scmp.ne.s32.totalorder %s43_s17, %s75_s0  ;;  %p81_p7 = scmp.lt.s32.totalorder %s75_s0, %s75_s0 }
  0x12   :  { %p82_p8 = por %p81_p7, %p80_p6 }
  0x14   :  { %p83_p9 = pnand %p82_p8, %p76_p5 }
  0x8a   :  { %v30_v4 = vpop.permute.xlu0 %29 }
  0x8b   :  { %v32_v5 = vmul.f32 %v30_v4, %v24_v2  ;;  %v33_v6 = vmul.f32 %v30_v4, %v25_v3 }
  0x8d   :  { %34 = vst [vmem:[#allocation5] sm:$0xff] %v32_v5  ;;  %35 = vst [vmem:[#allocation5 + $0x8] sm:$0xff] %v33_v6 }
  0x8e   :  { %86 = shalt.err (!%p83_p9)
}
  0x8f   :  { %45 = dma.vmem_to_hbm [thread:$0]  %s43_s17, 256, %s128_s2, [#allocation4]  }
  0x90   :  { %97 = dma.done.wait [#allocation4], 256  }
  0x91   :  { %98 = vsyncadd [#allocation4], 4294967040 }
  0x92   :  { %49 = vsyncpa [#allocation3], 1 }
  0x93   :  { %50 = vsyncpa [#allocation4], 1 }

</bundles_post_ra>
